<compile_context>
chip_gen: v5e
topology: v5e:2x2
jax: 0.10.0
libtpu: 0.0.40
codegen_flags: <defaults>
</compile_context>

<pallas_src>
import math
from functools import partial

import jax
import jax.numpy as jnp
from jax.experimental import pallas as pl
from jax.experimental.pallas import tpu as pltpu


def _diffs_kernel(dpat_ref, test_ref, train_ref, out_ref):
    """out[i, k] = test[i, k % D] - train_chunk[0, k] for the current tile."""
    t = test_ref[...]                      # (block_n, D)
    d = t.shape[1]
    # Expand the test rows across the lane axis: exp[i, k] = t[i, k % D].
    # Static chain of selects; for small D this is free filler hidden under
    # the output DMA (the kernel is HBM-write bound).
    exp = t[:, 0:1]
    if d > 1:
        dpat = dpat_ref[...].astype(jnp.int32)   # (1, block_md), lane k -> k % D
        for dd in range(1, d):
            exp = jnp.where(dpat == dd, t[:, dd:dd + 1], exp)
    out_ref[...] = (exp - train_ref[...]).astype(out_ref.dtype)


def _round_up(x, m):
    return ((x + m - 1) // m) * m


def _tpu_config():
    """Returns (vmem_limit_bytes, target_tile_bytes, num_tensorcores)."""
    try:
        kind = jax.devices()[0].device_kind.lower()
    except Exception:
        kind = ""
    if "v7" in kind or "7x" in kind:
        # v7x: 64 MiB VMEM per TensorCore, 2 TCs, 3.2 TB/s HBM.
        return 48 * 1024 * 1024, 4 * 1024 * 1024, 2
    if "v5" in kind or "v6" in kind:
        # v5e / v6e: 128 MiB VMEM, single TensorCore.
        return 96 * 1024 * 1024, 8 * 1024 * 1024, 1
    # Unknown chip: conservative budget that fits every generation.
    return 48 * 1024 * 1024, 4 * 1024 * 1024, 2


def _choose_tiles(n, md, d, itemsize, target_tile_bytes, num_cores):
    """Pick (block_n, block_md, grid_n, grid_md) for the (n, md) output slab."""
    # Row multiple matching the dtype's sublane packing (f32:8, bf16:16, i8:32).
    r = 8 * max(1, 4 // max(1, itemsize))
    n_r = _round_up(max(n, 1), r)

    # Lane tiling of the flattened M*D axis, only if a minimal-height tile of
    # the full width would not fit the per-step budget.  Chunks are a multiple
    # of lcm(D, 128): 128-lane aligned stores and an identical (lane % D)
    # pattern in every chunk.
    unit = d * 128 // math.gcd(d, 128)
    if md <= unit or md * itemsize * r <= target_tile_bytes:
        block_md = md
    else:
        block_md = max(unit, (target_tile_bytes // (r * itemsize)) // unit * unit)
        block_md = min(block_md, md)

    block_n = target_tile_bytes // max(1, block_md * itemsize)
    block_n = max(r, (block_n // r) * r)
    block_n = min(block_n, n_r)

    grid_n = pl.cdiv(n, block_n)
    grid_md = pl.cdiv(md, block_md)

    # Split rows for megacore sharding only where 2 TensorCores exist.
    if num_cores >= 2 and grid_n * grid_md == 1 and n_r >= 2 * r:
        block_n = max(r, _round_up(pl.cdiv(n, 2), r))
        grid_n = pl.cdiv(n, block_n)

    return block_n, block_md, grid_n, grid_md


@partial(jax.jit, static_argnames=("target_tile_bytes",))
def kernel_diffs(test_Xs, train_Xs, *, target_tile_bytes=None):
    """Pallas equivalent of Kernel._diffs: (N,*feat),(M,*feat) -> (N,M,*feat)."""
    n = test_Xs.shape[0]
    m = train_Xs.shape[0]
    feat = tuple(test_Xs.shape[1:])
    assert tuple(train_Xs.shape[1:]) == feat, "feature dims must match"
    d = int(math.prod(feat))          # math.prod(()) == 1 handles 1-D inputs
    md = m * d

    dtype = jnp.result_type(test_Xs.dtype, train_Xs.dtype)
    itemsize = jnp.dtype(dtype).itemsize

    vmem_limit, default_target, num_cores = _tpu_config()
    tgt = default_target if target_tile_bytes is None else int(target_tile_bytes)
    block_n, block_md, grid_n, grid_md = _choose_tiles(
        n, md, d, itemsize, tgt, num_cores)

    test2 = test_Xs.reshape(n, d).astype(dtype)
    train_flat = train_Xs.reshape(1, md).astype(dtype)
    # Lane k of any M*D chunk corresponds to feature index k % D
    # (block_md is always a multiple of D).  int8 keeps the resident buffer small.
    pat_dtype = jnp.int8 if d <= 127 else jnp.int32
    dpat = jnp.tile(jnp.arange(d, dtype=pat_dtype),
                    block_md // d).reshape(1, block_md)

    out_flat = pl.pallas_call(
        _diffs_kernel,
        out_shape=jax.ShapeDtypeStruct((n, md), dtype),
        grid=(grid_n, grid_md),
        in_specs=[
            pl.BlockSpec((1, block_md), lambda i, j: (0, 0)),      # dpat (resident)
            pl.BlockSpec((block_n, d), lambda i, j: (i, 0)),       # test row tile
            pl.BlockSpec((1, block_md), lambda i, j: (0, j)),      # train chunk
        ],
        out_specs=pl.BlockSpec((block_n, block_md), lambda i, j: (i, j)),
        compiler_params=pltpu.CompilerParams(
            dimension_semantics=("parallel", "parallel"),
            vmem_limit_bytes=vmem_limit,
        ),
    )(dpat, test2, train_flat)

    # Splitting the contiguous last dim back into (M, *feat) is a free reshape.
    return out_flat.reshape((n, m) + feat)


class PallasKernel:
    """JAX/Pallas mirror of the PyTorch `Kernel` base class."""

    def __init__(self, bandwidth=0.05, dimensions=1):
        self.dims = dimensions
        self.bandwidth = bandwidth

    def _diffs(self, test_Xs, train_Xs):
        return kernel_diffs(test_Xs, train_Xs)

    # TODO(synk): `forward` and `sample` are @abc.abstractmethod in the source
    # module (no defined computation), so they are intentionally not implemented.


if __name__ == "__main__":
    key = jax.random.PRNGKey(0)
    k_test, k_train, k_t1, k_r1, k_tb, k_rb = jax.random.split(key, 6)

    # (N, D) inputs; N deliberately NOT a multiple of the row tile.
    N, M, D = 37, 16, 4
    test_Xs = jax.random.normal(k_test, (N, D), dtype=jnp.float32)
    train_Xs = jax.random.normal(k_train, (M, D), dtype=jnp.float32)

    kern = PallasKernel(bandwidth=0.05, dimensions=D)
    diffs = jax.block_until_ready(kern._diffs(test_Xs, train_Xs))
    ref = test_Xs[:, None, :] - train_Xs[None, :, :]
    assert diffs.shape == (N, M, D)
    assert jnp.allclose(diffs, ref, atol=1e-6), "mismatch vs reference (2-D)"

    # 1-D inputs (feat == ()), as used by dimensions=1 KDEs.
    N1, M1 = 19, 8
    t1 = jax.random.normal(k_t1, (N1,), dtype=jnp.float32)
    r1 = jax.random.normal(k_r1, (M1,), dtype=jnp.float32)
    d1 = jax.block_until_ready(kernel_diffs(t1, r1))
    ref1 = t1[:, None] - r1[None, :]
    assert d1.shape == (N1, M1)
    assert jnp.allclose(d1, ref1, atol=1e-6), "mismatch vs reference (1-D)"

    # Force the tiled-M*D (2-D grid) path with a tiny per-step tile budget:
    # partial blocks on both the row axis and the lane-chunk axis.
    NB, MB, DB = 27, 66, 8          # M*D = 528 -> chunks of 256 lanes
    tb = jax.random.normal(k_tb, (NB, DB), dtype=jnp.float32)
    rb = jax.random.normal(k_rb, (MB, DB), dtype=jnp.float32)
    db = jax.block_until_ready(kernel_diffs(tb, rb, target_tile_bytes=8192))
    refb = tb[:, None, :] - rb[None, :, :]
    assert db.shape == (NB, MB, DB)
    assert jnp.allclose(db, refb, atol=1e-6), "mismatch vs reference (tiled M*D)"

    print("KERNEL_OK")
</pallas_src>

<mosaic_0001>
module attributes {stable_mosaic.version = 11 : i64} {
  func.func @_diffs_kernel(%arg0: i32, %arg1: i32, %arg2: memref<1x64xi8, #tpu.memory_space<vmem>>, %arg3: memref<24x4xf32, #tpu.memory_space<vmem>>, %arg4: memref<1x64xf32, #tpu.memory_space<vmem>>, %arg5: memref<24x64xf32, #tpu.memory_space<vmem>>) attributes {dimension_semantics = [#tpu.dimension_semantics<parallel>, #tpu.dimension_semantics<parallel>], iteration_bounds = array<i64: 2, 1>, scalar_prefetch = 0 : i64, scratch_operands = 0 : i64, tpu.core_type = #tpu.core_type<tc>, window_params = [{pipeline_mode = #tpu.pipeline_mode<synchronous>, transform_indices = @transform_0, window_bounds = array<i64: 1, 64>}, {transform_indices = @transform_1, window_bounds = array<i64: 24, 4>}, {transform_indices = @transform_2, window_bounds = array<i64: 1, 64>}, {transform_indices = @transform_3, window_bounds = array<i64: 24, 64>}]} {
    %c0 = arith.constant 0 : index
    %c0_0 = arith.constant 0 : index
    %0 = vector.load %arg3[%c0, %c0_0] : memref<24x4xf32, #tpu.memory_space<vmem>>, vector<24x4xf32>
    %1 = vector.extract_strided_slice %0 {offsets = [0, 0], sizes = [24, 1], strides = [1, 1]} : vector<24x4xf32> to vector<24x1xf32>
    %c0_1 = arith.constant 0 : index
    %c0_2 = arith.constant 0 : index
    %2 = vector.load %arg2[%c0_1, %c0_2] : memref<1x64xi8, #tpu.memory_space<vmem>>, vector<1x64xi8>
    %3 = arith.extsi %2 : vector<1x64xi8> to vector<1x64xi32>
    %c1_i32 = arith.constant 1 : i32
    %4 = vector.broadcast %c1_i32 : i32 to vector<1x64xi32>
    %5 = arith.cmpi eq, %3, %4 : vector<1x64xi32>
    %6 = vector.extract_strided_slice %0 {offsets = [0, 1], sizes = [24, 1], strides = [1, 1]} : vector<24x4xf32> to vector<24x1xf32>
    %7 = vector.shape_cast %5 : vector<1x64xi1> to vector<1x64xi1>
    %8 = vector.broadcast %7 : vector<1x64xi1> to vector<24x64xi1>
    %9 = vector.shape_cast %6 : vector<24x1xf32> to vector<24x1xf32>
    %10 = vector.broadcast %9 : vector<24x1xf32> to vector<24x64xf32>
    %11 = vector.shape_cast %1 : vector<24x1xf32> to vector<24x1xf32>
    %12 = vector.broadcast %11 : vector<24x1xf32> to vector<24x64xf32>
    %13 = arith.select %8, %10, %12 : vector<24x64xi1>, vector<24x64xf32>
    %c2_i32 = arith.constant 2 : i32
    %14 = vector.broadcast %c2_i32 : i32 to vector<1x64xi32>
    %15 = arith.cmpi eq, %3, %14 : vector<1x64xi32>
    %16 = vector.extract_strided_slice %0 {offsets = [0, 2], sizes = [24, 1], strides = [1, 1]} : vector<24x4xf32> to vector<24x1xf32>
    %17 = vector.shape_cast %15 : vector<1x64xi1> to vector<1x64xi1>
    %18 = vector.broadcast %17 : vector<1x64xi1> to vector<24x64xi1>
    %19 = vector.shape_cast %16 : vector<24x1xf32> to vector<24x1xf32>
    %20 = vector.broadcast %19 : vector<24x1xf32> to vector<24x64xf32>
    %21 = arith.select %18, %20, %13 : vector<24x64xi1>, vector<24x64xf32>
    %c3_i32 = arith.constant 3 : i32
    %22 = vector.broadcast %c3_i32 : i32 to vector<1x64xi32>
    %23 = arith.cmpi eq, %3, %22 : vector<1x64xi32>
    %24 = vector.extract_strided_slice %0 {offsets = [0, 3], sizes = [24, 1], strides = [1, 1]} : vector<24x4xf32> to vector<24x1xf32>
    %25 = vector.shape_cast %23 : vector<1x64xi1> to vector<1x64xi1>
    %26 = vector.broadcast %25 : vector<1x64xi1> to vector<24x64xi1>
    %27 = vector.shape_cast %24 : vector<24x1xf32> to vector<24x1xf32>
    %28 = vector.broadcast %27 : vector<24x1xf32> to vector<24x64xf32>
    %29 = arith.select %26, %28, %21 : vector<24x64xi1>, vector<24x64xf32>
    %c0_3 = arith.constant 0 : index
    %c0_4 = arith.constant 0 : index
    %30 = vector.load %arg4[%c0_3, %c0_4] : memref<1x64xf32, #tpu.memory_space<vmem>>, vector<1x64xf32>
    %31 = vector.broadcast %30 : vector<1x64xf32> to vector<24x64xf32>
    %32 = arith.subf %29, %31 : vector<24x64xf32>
    %c0_5 = arith.constant 0 : index
    %c0_6 = arith.constant 0 : index
    %33 = vector.load %arg5[%c0_5, %c0_6] : memref<24x64xf32, #tpu.memory_space<vmem>>, vector<24x64xf32>
    tpu.vector_store %arg5[%c0_5, %c0_6], %32 {strides = array<i32>} : memref<24x64xf32, #tpu.memory_space<vmem>>, vector<24x64xf32>,
    return
  }
  func.func @transform_0(%arg0: i32, %arg1: i32) -> (i32, i32) {
    %c0_i32 = arith.constant 0 : i32
    %c0_i32_0 = arith.constant 0 : i32
    %c0_i32_1 = arith.constant 0 : i32
    return %c0_i32, %c0_i32_0 : i32, i32
  }
  func.func @transform_1(%arg0: i32, %arg1: i32) -> (i32, i32) {
    %c0_i32 = arith.constant 0 : i32
    %c0_i32_0 = arith.constant 0 : i32
    return %arg0, %c0_i32 : i32, i32
  }
  func.func @transform_2(%arg0: i32, %arg1: i32) -> (i32, i32) {
    %c0_i32 = arith.constant 0 : i32
    %c0_i32_0 = arith.constant 0 : i32
    return %c0_i32, %arg1 : i32, i32
  }
  func.func @transform_3(%arg0: i32, %arg1: i32) -> (i32, i32) {
    %c0_i32 = arith.constant 0 : i32
    return %arg0, %arg1 : i32, i32
  }
}

</mosaic_0001>

<bundles_post_ra>
// kernel: tile.9
= control target key start
LH: loop header
LB: loop body
LE: loop exit
PB: predicated region body
PF: predicated region fallthrough
CT: control target
= control target key end

     0   :  { %s150_s8 = smov 52   ;;  %s151_s9 = smov 44   ;;  %vm33_vm0 = vcmask 31744   ;;  %vm39_vm1 = vcmask 523744   ;;  %vm45_vm2 = vcmask 490944   ;;  %vm51_vm3 = vcmask 458144   ;;  %s180_s0 = inlined_call_operand.vmem [shape: s8[16,4], index: 0, kind: input, shape index: {}]   ;;  %s181_s1 = inlined_call_operand.vmem [shape: s8[1,64], index: 1, kind: output, shape index: {}]  }
   0x1   :  { %v133_v0 = vld [vmem:[%s180_s0] sm:$0xf]   ;;  %s149_s0 = smov 60   ;;  %s152_s10 = smov 56   ;;  %vm57_vm4 = vcmask 425344   ;;  %vm63_vm5 = vcmask 392544  }
   0x2   :  { %v13_v1 = vunpack.c.1.s8 %v133_v0  ;;  %v27_v2 = vunpack.c.0.s8 %v133_v0  ;;  %s153_s11 = smov 48   ;;  %s154_s12 = smov 40   ;;  %vm69_vm6 = vcmask 359744   ;;  %vm75_vm7 = vcmask 326944  }
   0x3   :  { %s155_s13 = smov 36   ;;  %s156_s14 = smov 32   ;;  %vm81_vm8 = vcmask 294144   ;;  %vm87_vm9 = vcmask 261344   ;;  %vm93_vm10 = vcmask 228544   ;;  %vm99_vm11 = vcmask 195744  }
   0x4   :  { %18 = vst [vmem:[#allocation1 + $0x8] sm:$0xff] %v13_v1  ;;  %s157_s15 = smov 28   ;;  %s158_s16 = smov 24   ;;  %vm105_vm12 = vcmask 162944   ;;  %vm111_vm13 = vcmask 130144   ;;  %vm117_vm14 = vcmask 97344  }
   0x5   :  { %31 = vst [vmem:[#allocation1] sm:$0xff] %v27_v2  ;;  %s159_s17 = smov 20   ;;  %s160_s18 = smov 16   ;;  %vm123_vm15 = vcmask 64544  }
   0x6   :  { %s161_s19 = smov 12   ;;  %s162_s20 = smov 8  }
   0x7   :  { %s163_s21 = smov 4  }
   0xb   :  { %v36_v3 = vld [vmem:[#allocation1 + $0xf] sm:$0x1]   ;;  %v48_v4 = vld [vmem:[#allocation1 + $0xd] sm:$0x1]   ;;  %v60_v5 = vld [vmem:[#allocation1 + $0xb] sm:$0x1]  }
   0xc   :  { %37 = vrot.lane.b32.xlu0 %v36_v3, %s149_s0  ;;  %49 = vrot.lane.b32.xlu1 %v48_v4, %s150_s8  ;;  %v32_v6 = vld [vmem:[#allocation1] sm:$0x1]   ;;  %v42_v7 = vld [vmem:[#allocation1 + $0xe] sm:$0x1]   ;;  %v54_v8 = vld [vmem:[#allocation1 + $0xc] sm:$0x1]  }
   0xd   :  { %61 = vrot.lane.b32.xlu2 %v60_v5, %s151_s9  ;;  %34 = vst.msk [vmem:[#allocation0] sm:$0x1] %vm33_vm0, %v32_v6   ;;  %v66_v9 = vld [vmem:[#allocation1 + $0xa] sm:$0x1]   ;;  %v72_v10 = vld [vmem:[#allocation1 + $0x9] sm:$0x1]  }
   0xe   :  { %v78_v11 = vld [vmem:[#allocation1 + $0x8] sm:$0x1]   ;;  %v84_v12 = vld [vmem:[#allocation1 + $0x7] sm:$0x1]   ;;  %v90_v13 = vld [vmem:[#allocation1 + $0x6] sm:$0x1]  }
   0xf   :  { %v96_v14 = vld [vmem:[#allocation1 + $0x5] sm:$0x1]   ;;  %v102_v15 = vld [vmem:[#allocation1 + $0x4] sm:$0x1]   ;;  %v108_v16 = vld [vmem:[#allocation1 + $0x3] sm:$0x1]  }
  0x10   :  { %v114_v17 = vld [vmem:[#allocation1 + $0x2] sm:$0x1]   ;;  %v120_v18 = vld [vmem:[#allocation1 + $0x1] sm:$0x1]  }
  0x14   :  { %43 = vrot.lane.b32.xlu0 %v42_v7, %s152_s10  ;;  %55 = vrot.lane.b32.xlu1 %v54_v8, %s153_s11 }
  0x15   :  { %67 = vrot.lane.b32.xlu2 %v66_v9, %s154_s12 }
  0x1c   :  { %73 = vrot.lane.b32.xlu0 %v72_v10, %s155_s13  ;;  %79 = vrot.lane.b32.xlu1 %v78_v11, %s156_s14 }
  0x1d   :  { %85 = vrot.lane.b32.xlu2 %v84_v12, %s157_s15 }
  0x24   :  { %91 = vrot.lane.b32.xlu0 %v90_v13, %s158_s16  ;;  %97 = vrot.lane.b32.xlu1 %v96_v14, %s159_s17 }
  0x25   :  { %103 = vrot.lane.b32.xlu2 %v102_v15, %s160_s18 }
  0x2c   :  { %109 = vrot.lane.b32.xlu0 %v108_v16, %s161_s19  ;;  %115 = vrot.lane.b32.xlu1 %v114_v17, %s162_s20 }
  0x2d   :  { %121 = vrot.lane.b32.xlu2 %v120_v18, %s163_s21 }
  0x67   :  { %v62_v19 = vpop.permute.xlu2 %61  }
  0x6f   :  { %v68_v20 = vpop.permute.xlu2 %67  }
  0x77   :  { %v86_v21 = vpop.permute.xlu2 %85  }
  0x7e   :  { %v38_v22 = vpop.permute.xlu0 %37   ;;  %v50_v23 = vpop.permute.xlu1 %49  }
  0x7f   :  { %40 = vst.msk [vmem:[#allocation0] sm:$0x1] %vm39_vm1, %v38_v22   ;;  %v104_v24 = vpop.permute.xlu2 %103  }
  0x86   :  { %v44_v25 = vpop.permute.xlu0 %43   ;;  %v56_v26 = vpop.permute.xlu1 %55  }
  0x87   :  { %46 = vst.msk [vmem:[#allocation0] sm:$0x1] %vm45_vm2, %v44_v25   ;;  %v122_v27 = vpop.permute.xlu2 %121  }
  0x88   :  { %52 = vst.msk [vmem:[#allocation0] sm:$0x1] %vm51_vm3, %v50_v23  }
  0x89   :  { %58 = vst.msk [vmem:[#allocation0] sm:$0x1] %vm57_vm4, %v56_v26  }
  0x8a   :  { %64 = vst.msk [vmem:[#allocation0] sm:$0x1] %vm63_vm5, %v62_v19  }
  0x8b   :  { %70 = vst.msk [vmem:[#allocation0] sm:$0x1] %vm69_vm6, %v68_v20  }
  0x8e   :  { %v74_v28 = vpop.permute.xlu0 %73   ;;  %v80_v29 = vpop.permute.xlu1 %79  }
  0x8f   :  { %76 = vst.msk [vmem:[#allocation0] sm:$0x1] %vm75_vm7, %v74_v28  }
  0x90   :  { %82 = vst.msk [vmem:[#allocation0] sm:$0x1] %vm81_vm8, %v80_v29  }
  0x91   :  { %88 = vst.msk [vmem:[#allocation0] sm:$0x1] %vm87_vm9, %v86_v21  }
  0x96   :  { %v92_v30 = vpop.permute.xlu0 %91   ;;  %v98_v31 = vpop.permute.xlu1 %97  }
  0x97   :  { %94 = vst.msk [vmem:[#allocation0] sm:$0x1] %vm93_vm10, %v92_v30  }
  0x98   :  { %100 = vst.msk [vmem:[#allocation0] sm:$0x1] %vm99_vm11, %v98_v31  }
  0x99   :  { %106 = vst.msk [vmem:[#allocation0] sm:$0x1] %vm105_vm12, %v104_v24  }
  0x9e   :  { %v110_v32 = vpop.permute.xlu0 %109   ;;  %v116_v33 = vpop.permute.xlu1 %115  }
  0x9f   :  { %112 = vst.msk [vmem:[#allocation0] sm:$0x1] %vm111_vm13, %v110_v32  }
  0xa0   :  { %118 = vst.msk [vmem:[#allocation0] sm:$0x1] %vm117_vm14, %v116_v33  }
  0xa1   :  { %124 = vst.msk [vmem:[#allocation0] sm:$0x1] %vm123_vm15, %v122_v27  }
  0xa8   :  { %v127_v34 = vld [vmem:[#allocation0] sm:$0xf] }
  0xa9   :  { %v130_v35 = vpack.c.b16 0, %v127_v34 }
  0xab   :  { %v131_v36 = vpack.c.b8 0, %v130_v35 }
  0xad   :  { %132 = vst [vmem:[%s181_s1] sm:$0x1] %v131_v36 }

// kernel: kernel_diffs.1
= control target key start
LH: loop header
LB: loop body
LE: loop exit
PB: predicated region body
PF: predicated region fallthrough
CT: control target
= control target key end

     0   :  { %s832_s12 = smov 0   ;;  %s834_s13 = smov 0   ;;  %s963_s0 = inlined_call_operand.vmem [shape: s8[1,64], index: 0, kind: input, shape index: {}]   ;;  %s964_s1 = inlined_call_operand.vmem [shape: f32[37,4], index: 1, kind: input, shape index: {}]   ;;  %s965_s2 = inlined_call_operand.vmem [shape: f32[1,64], index: 2, kind: input, shape index: {}]   ;;  %s966_s3 = inlined_call_operand.vmem [shape: f32[37,64], index: 3, kind: output, shape index: {}]  }
   0x1   :  { %s836_s14 = smov 0   ;;  %s838_s15 = smov 0  }
   0x2   :  { %s840_s16 = smov 0  }
   0x3 LB: > { %s557_s17 = sadd.s32 4294967295, %s774_s16   ;;  %s25_s18 = sadd.s32 1, %s770_s15  ;;  %s774_s16 = sphi %s840_s16, %s13_s16   ;;  %s770_s15 = sphi %s838_s15, %s975_s15   ;;  %s766_s14 = sphi %s836_s14, %s974_s14   ;;  %s762_s13 = sphi %s834_s13, %s973_s13   ;;  %s758_s12 = sphi %s832_s12, %s972_s12  }
   0x4   : > { %p27_p0 = scmp.ge.s32.totalorder %s25_s18, 2  ;;  %s107_s19 = sadd.s32 1, %s762_s13 }
   0x5   : > { %p117_p1 = scmp.ne.s32.totalorder %s762_s13, %s758_s12  ;;  %p118_p2 = scmp.eq.s32.totalorder %s557_s17, 1 }
   0x6   : > { %s977_s18 = smov (%p27_p0, %s25_s18), 0  ;;  %p562_p4 = scmp.ge.s32.totalorder %s774_s16, 1 }
   0x7   : > { %p864_p3 = por %p118_p2, %p117_p1  ;;  %s102_s21 = ssub.s32 %s770_s15, %s977_s18 }
   0x8   : > { %p168_p5 = scmp.lt.s32.totalorder %s774_s16, 3  ;;  %p105_p6 = scmp.eq.s32.totalorder %s102_s21, 0 }
   0xa   : > { %p169_p7 = pnand %p562_p4, %p168_p5 }
   0xb   : > { %s873_s22 = scalar_select %p105_p6, %s762_s13, %s107_s19  }
   0xc   : > { %172 = sbr.rel (%p169_p7) target bundleno = 222 (0xde), region = 32  ;;  %s195_s4 = sand.u32 (!%p169_p7), 1, %s758_s12  }
   0xd   : > { %s876_s23 = smul.u32 (!%p169_p7), 3, %s766_s14 }
   0xe   : > { %s577_s5 = smul.u32 (!%p169_p7), 24, %s195_s4 }
   0xf   : > { %p203_p8 = scmp.lt.s32.totalorder (!%p169_p7), %s876_s23, 4 }
  0x10   : > { %s904_s8 = scalar_lea.vmem (!%p169_p7), [#allocation2], %s577_s5  }
  0x11   : > { %v808_v0 = vmov 1   ;;  %v809_v1 = vmov 0   ;;  %s204_s24 = scalar_select %p203_p8, %s876_s23, 4  ;;  %v810_v5 = vmov 2   ;;  %v811_v6 = vmov 3  }
  0x12   : > { %688 = vset.pattern.permute.xlu1 %v808_v0  ;;  %687 = vset.pattern.permute.xlu0 %v808_v0  ;;  %v223_v9 = vld [vmem:[%s963_s0] sm:$0x1]  ;;  %vm304_vm6 = vcmask 523264   ;;  %s316_s9 = ssub.s32 (%p864_p3), 5, %s876_s23  ;;  %s576_s10 = smul.u32 (%p864_p3), 24, %s766_s14 }
  0x13   : > { %690 = vset.pattern.permute.xlu2 %v809_v1  ;;  %s563_s25 = sshll.u32 %s204_s24, 3  ;;  %v224_v12 = vunpack.c.0.s8 %v223_v9  ;;  %v697_v25 = vld [vmem:[%s965_s2] ss:$0 sm:$0xff]  ;;  %p317_p9 = scmp.lt.s32.totalorder (%p864_p3), %s316_s9, 3 }
  0x14   : > { %s206_s28 = scalar_lea.vmem %s964_s1, %s563_s25  ;;  %s925_s17 = scalar_lea.vmem (%p864_p3), %s966_s3, %s576_s10  }
  0x15   : > { %v222_v2 = vld [vmem:[%s206_s28 + $0x10] sm:$0xff]  ;;  %v220_v3 = vld [vmem:[%s206_s28] sm:$0xff]  ;;  %v221_v4 = vld [vmem:[%s206_s28 + $0x8] sm:$0xff]  ;;  %vm225_vm0 = vcmp.eq.s32.totalorder %v224_v12, 1  ;;  %vm278_vm1 = vcmp.eq.s32.totalorder %v224_v12, 3  ;;  %vm259_vm2 = vcmp.eq.s32.totalorder %v224_v12, 2 }
  0x16   : > { %241 = vperm.xlu1 %688, %v222_v2   ;;  %231 = vperm.xlu0 %687, %v220_v3   ;;  %v226_v16 = vsel %vm225_vm0, 1, %v809_v1  ;;  %v279_v17 = vsel %vm278_vm1, 1, %v809_v1  ;;  %v260_v18 = vsel %vm259_vm2, 1, %v809_v1 }
  0x17   : > { %249 = vperm.xlu2 %690, %v221_v4   ;;  %v227_v19 = vperm.slane %v226_v16, 0  ;;  %v280_v20 = vperm.slane %v279_v17, 0  ;;  %v261_v21 = vperm.slane %v260_v18, 0 }
  0x19   : > { %vm887_vm3 = vcmp.eq.s32.totalorder %v227_v19, 1  ;;  %vm891_vm4 = vcmp.eq.s32.totalorder %v280_v20, 1  ;;  %vm262_vm5 = vcmp.eq.s32.totalorder %v261_v21, 1 }
  0x1e   : > { %689 = vset.pattern.permute.xlu1 %v809_v1  ;;  %236 = vperm.xlu0 %687, %v221_v4  }
  0x1f   : > { %245 = vperm.xlu1 %689, %v220_v3   ;;  %253 = vperm.xlu2 %690, %v222_v2  }
  0x26   : > { %691 = vset.pattern.permute.xlu0 %v810_v5 }
  0x27   : > { %692 = vset.pattern.permute.xlu1 %v810_v5  ;;  %264 = vperm.xlu0 %691, %v220_v3  }
  0x28   : > { %268 = vperm.xlu1 %692, %v221_v4   ;;  %693 = vset.pattern.permute.xlu2 %v810_v5 }
  0x29   : > { %272 = vperm.xlu2 %693, %v222_v2  }
  0x2f   : > { %696 = vset.pattern.permute.xlu0 %v811_v6 }
  0x30   : > { %694 = vset.pattern.permute.xlu1 %v811_v6  ;;  %291 = vperm.xlu0 %696, %v222_v2  }
  0x31   : > { %283 = vperm.xlu1 %694, %v220_v3   ;;  %695 = vset.pattern.permute.xlu2 %v811_v6 }
  0x32   : > { %287 = vperm.xlu2 %695, %v221_v4  }
  0x71   : > { %v250_v7 = vpop.permute.xlu2 %249 }
  0x79   : > { %v254_v8 = vpop.permute.xlu2 %253 }
  0x83   : > { %v273_v14 = vpop.permute.xlu2 %272 }
  0x88   : > { %v242_v10 = vpop.permute.xlu1 %241  ;;  %v232_v11 = vpop.permute.xlu0 %231 }
  0x89   : > { %v258_v32 = vsel %vm887_vm3, %v242_v10, %v254_v8 }
  0x8a   : > { %v277_v33 = vsel %vm262_vm5, %v273_v14, %v258_v32 }
  0x8c   : > { %v288_v26 = vpop.permute.xlu2 %287 }
  0x90   : > { %v237_v13 = vpop.permute.xlu0 %236 }
  0x91   : > { %v246_v15 = vpop.permute.xlu1 %245  ;;  %v257_v27 = vsel %vm887_vm3, %v237_v13, %v250_v7 }
  0x92   : > { %v256_v34 = vsel %vm887_vm3, %v232_v11, %v246_v15 }
  0x99   : > { %v265_v23 = vpop.permute.xlu0 %264 }
  0x9a   : > { %v269_v28 = vpop.permute.xlu1 %268  ;;  %v275_v36 = vsel %vm262_vm5, %v265_v23, %v256_v34 }
  0x9b   : > { %v276_v29 = vsel %vm262_vm5, %v269_v28, %v257_v27 }
  0x9c   : > { %v295_v30 = vsel %vm891_vm4, %v288_v26, %v276_v29 }
  0x9d   : > { %v302_v31 = vsub.f32 %v295_v30, %v697_v25 }
  0x9f   : > { %306 = vst.msk [vmem:[%s904_s8 + $0x8] sm:$0xff] %vm304_vm6, %v302_v31 }
  0xa2   : > { %v292_v35 = vpop.permute.xlu0 %291 }
  0xa3   : > { %v296_v37 = vsel %vm891_vm4, %v292_v35, %v277_v33  ;;  %v284_v38 = vpop.permute.xlu1 %283  ;;  %314 = sbr.rel (!%p864_p3) target bundleno = 222 (0xde), region = 36 }
  0xa4   : > { %v303_v39 = vsub.f32 %v296_v37, %v697_v25  ;;  %v294_v40 = vsel %vm891_vm4, %v284_v38, %v275_v36 }
  0xa5   : > { %v301_v41 = vsub.f32 %v294_v40, %v697_v25 }
  0xa6   : > { %307 = vst.msk [vmem:[%s904_s8 + $0x10] sm:$0xff] %vm304_vm6, %v303_v39 }
  0xa7   : > { %305 = vst.msk [vmem:[%s904_s8] sm:$0xff] %vm304_vm6, %v301_v41 }
  0xa8   : > { %s979_s9 = smov (!%p317_p9, %s316_s9), 3 }
  0xa9   : > { %s564_s19 = sshll.u32 %s979_s9, 3 }
  0xaa   : > { %p567_p10 = scmp.eq.s32.totalorder %s564_s19, 0 }
  0xab   : > { %698 = sdivrem.u32 (!%p567_p10), %s979_s9, 3 }
  0xac   : > { %326 = sbr.rel (%p567_p10) target bundleno = 222 (0xde), region = 40 }
  0xb4   : > { %s931_s20 = spop.drf %698 }
  0xb5   : > { %s700_s21 = spop.drf %698  ;;  %p568_p11 = scmp.le.s32.totalorder %s931_s20, 0 }
  0xb6   : > { %s776_s14 = smov (!%p568_p11), %s925_s17   ;;  %s780_s23 = smov (!%p568_p11), %s904_s8  }
  0xb7   : > { %496 = sbr.rel (%p568_p11) target bundleno = 196 (0xc4), region = 119  ;;  %s784_s24 = smov (!%p568_p11), 0  }
  0xb8   : > { %s788_s25 = smov (!%p568_p11), 0  }
  0xbc LB: >> { %v395_v42 = vld [vmem:[%s782_s23] sm:$0xff]  ;;  %v397_v43 = vld [vmem:[%s782_s23 + $0x8] sm:$0xff]  ;;  %v399_v44 = vld [vmem:[%s782_s23 + $0x10] sm:$0xff]  ;;  %s401_s26 = sadd.s32 1, %s786_s24  ;;  %s389_s25 = sadd.s32 1, %s790_s25   ;;  %s790_s25 = sphi %s788_s25, %s389_s25   ;;  %s786_s24 = sphi %s784_s24, %s785_s24   ;;  %s782_s23 = sphi %s780_s23, %s406_s23   ;;  %s778_s14 = sphi %s776_s14, %s407_s14  }
  0xbd   : >> { %396 = vst [vmem:[%s778_s14] sm:$0xff] %v395_v42  ;;  %p402_p12 = scmp.ge.s32.totalorder %s401_s26, %s931_s20  ;;  %p388_p13 = scmp.ge.s32.totalorder %s389_s25, %s931_s20 }
  0xbe   : >> { %398 = vst [vmem:[%s778_s14 + $0x8] sm:$0xff] %v397_v43 }
  0xbf   : >> { %400 = vst [vmem:[%s778_s14 + $0x10] sm:$0xff] %v399_v44  ;;  %s981_s26 = smov (%p402_p12, %s401_s26), 0  ;;  %391 = sbr.rel (!%p388_p13) target bundleno = 188 (0xbc), region = 125 }
  0xc0   : >> { %s404_s27 = smul.u32 24, %s981_s26  ;;  %s785_s24 = smov %s981_s26  }
  0xc2   : >> { %s406_s23 = scalar_lea.vmem %s904_s8, %s404_s27 [#allocation2]   ;;  %s407_s14 = scalar_lea.vmem %s925_s17, %s404_s27  }
  0xc4 PF: > { %701 = sdivrem.u32 %s979_s9, 3 }
  0xc5   : > { %s569_s28 = smul.u32 24, %s931_s20 }
  0xc7   : > { %s943_s29 = scalar_lea.vmem %s904_s8, %s569_s28 [#allocation2]   ;;  %s414_s30 = scalar_lea.vmem %s925_s17, %s569_s28  }
  0xcd   : > { %s702_s4 = spop.drf %701 }
  0xce   : > { %s703_s5 = spop.drf %701 }
  0xcf   : > { %p571_p0 = scmp.le.s32.totalorder %s703_s5, 0 }
  0xd0   : > { %s792_s6 = smov (!%p571_p0), %s414_s30   ;;  %s796_s7 = smov (!%p571_p0), %s943_s29  }
  0xd1   : > { %510 = sbr.rel (%p571_p0) target bundleno = 222 (0xde), region = 130  ;;  %s800_s10 = smov (!%p571_p0), 0  }
  0xd2   : > { %s804_s11 = smov (!%p571_p0), 0  }
  0xd6 LB: >> { %v424_v45 = vld [vmem:[%s798_s7] sm:$0xff]  ;;  %s426_s8 = sadd.s32 1, %s802_s10  ;;  %s418_s11 = sadd.s32 1, %s806_s11   ;;  %s806_s11 = sphi %s804_s11, %s418_s11   ;;  %s802_s10 = sphi %s800_s10, %s801_s10   ;;  %s798_s7 = sphi %s796_s7, %s431_s7   ;;  %s794_s6 = sphi %s792_s6, %s432_s6  }
  0xd7   : >> { %425 = vst [vmem:[%s794_s6] sm:$0xff] %v424_v45  ;;  %p427_p1 = scmp.ge.s32.totalorder %s426_s8, %s703_s5  ;;  %p417_p2 = scmp.ge.s32.totalorder %s418_s11, %s703_s5 }
  0xd9   : >> { %s983_s8 = smov (%p427_p1, %s426_s8), 0  ;;  %420 = sbr.rel (!%p417_p2) target bundleno = 214 (0xd6), region = 136 }
  0xda   : >> { %s572_s9 = sshll.u32 %s983_s8, 3  ;;  %s801_s10 = smov %s983_s8  }
  0xdb   : >> { %s431_s7 = scalar_lea.vmem %s943_s29, %s572_s9 [#allocation2]   ;;  %s432_s6 = scalar_lea.vmem %s414_s30, %s572_s9  }
  0xde PF: > { %s13_s16 = sadd.s32 1, %s774_s16   ;;  %s972_s12 = smov %s762_s13 }
  0xdf   : > { %p10_p3 = scmp.ge.s32.totalorder %s13_s16, 4   ;;  %s973_s13 = smov %s873_s22 }
  0xe0   : > { %s974_s14 = smov %s770_s15  ;;  %s975_s15 = smov %s977_s18 }
  0xe1   :  { %12 = sbr.rel (!%p10_p3) target bundleno = 3 (0x3), region = 147 }

</bundles_post_ra>
